<compile_context>
chip_gen: v5e
topology: v5e:2x2
jax: 0.10.0
libtpu: 0.0.40
codegen_flags: <defaults>
</compile_context>

<pallas_src>
import functools
import math
from typing import Any, NamedTuple

import jax
import jax.numpy as jnp
from jax import lax
from jax.experimental import pallas as pl
from jax.experimental.pallas import tpu as pltpu


_INV_SQRT2 = 1.0 / math.sqrt(2.0)


def _gelu_erf_f32(x_f32):
    # nn.GELU() default: exact erf-based GELU, computed in f32.
    return 0.5 * x_f32 * (1.0 + lax.erf(x_f32 * _INV_SQRT2))


def _round_up(x, m):
    return ((x + m - 1) // m) * m


def _cdiv(a, b):
    return -(-a // b)


def _tpu_generation():
    """Best-effort TPU generation from device_kind (5, 6, 7, ...)."""
    try:
        kind = jax.devices()[0].device_kind.lower()
    except Exception:  # pragma: no cover - defensive
        return 6
    if "v4" in kind:
        return 4
    if "v5" in kind:
        return 5
    if "v6" in kind:
        return 6
    if "7" in kind:
        return 7
    return 6


def _align_feature(n, gen):
    """Lane-dense alignment; prefer 256-multiples for the 2x256 MXU (v6e/v7x)."""
    if gen >= 6 and n > 128:
        return _round_up(n, 256)
    return _round_up(n, 128)


# ----------------------------------------------------------------------------
# Kernels
# ----------------------------------------------------------------------------

def _mlp_kernel_resident(x_ref, w1_ref, b1_ref, w2_ref, b2_ref, o_ref):
    """Whole hidden dim in one pass; weights stay resident (constant index maps).

    Grid = (num_m_tiles,).
    """
    h = jnp.dot(x_ref[...], w1_ref[...], preferred_element_type=jnp.float32)
    h = _gelu_erf_f32(h + b1_ref[...])          # bias + GELU in f32
    # dropout(p=0.0) is the identity.
    y = jnp.dot(h.astype(w2_ref.dtype), w2_ref[...],
                preferred_element_type=jnp.float32)
    o_ref[...] = (y + b2_ref[...]).astype(o_ref.dtype)


def _mlp_kernel_htiled(x_ref, w1_ref, b1_ref, w2_ref, b2_ref, o_ref, acc_ref):
    """Hidden dim tiled as a trailing reduction axis.

    Grid = (num_m_tiles, num_h_tiles) with num_h_tiles >= 2.
    First step writes acc = partial (no zero-init pass); last step writes the
    output directly as acc + partial + b2 (no extra acc round-trip).
    """
    h_idx = pl.program_id(1)
    last = pl.num_programs(1) - 1

    h = jnp.dot(x_ref[...], w1_ref[...], preferred_element_type=jnp.float32)
    h = _gelu_erf_f32(h + b1_ref[...])          # bias + GELU in f32
    part = jnp.dot(h.astype(w2_ref.dtype), w2_ref[...],
                   preferred_element_type=jnp.float32)

    @pl.when(h_idx == 0)
    def _():
        acc_ref[...] = part

    @pl.when(jnp.logical_and(h_idx > 0, h_idx < last))
    def _():
        acc_ref[...] += part

    @pl.when(h_idx == last)
    def _():
        o_ref[...] = (acc_ref[...] + part + b2_ref[...]).astype(o_ref.dtype)


# ----------------------------------------------------------------------------
# One-time parameter preparation (hoisted padding / casting) + plan
# ----------------------------------------------------------------------------

class _MLPPlan(NamedTuple):
    in_feat: int
    hid_feat: int
    out_feat: int
    in_pad: int
    hid_pad: int
    out_pad: int
    tile_h: int          # == hid_pad when weights are VMEM-resident
    max_tile_m: int
    matmul_dtype: Any
    gen: int


def prepare_mlp_params(w1, b1, w2, b2, *, matmul_dtype=jnp.bfloat16,
                       tile_h=512, max_tile_m=None, gen=None,
                       force_hidden_tiling=False):
    """Pad + cast weights ONCE and decide the tiling plan.

    w1: (in_feat, hid_feat), w2: (hid_feat, out_feat) (transposed vs PyTorch).
    Returns (arrays_dict, plan).  Call `mlp_pallas_apply(x, arrays, plan)`.
    """
    gen = _tpu_generation() if gen is None else gen
    in_feat, hid_feat = w1.shape
    hid2, out_feat = w2.shape
    assert hid2 == hid_feat, "w1/w2 hidden dims disagree"

    bpe = jnp.dtype(matmul_dtype).itemsize
    min_rows = 16 if bpe == 2 else 8

    in_pad = _align_feature(in_feat, gen)
    out_pad = _align_feature(out_feat, gen)
    hid_aligned = _align_feature(hid_feat, gen)

    if max_tile_m is None:
        # v5e is most HBM-BW bound -> larger M tiles cut weight re-streams when
        # the hidden axis ends up tiled; v7x has only 64 MiB VMEM -> keep 256.
        max_tile_m = 512 if gen == 5 else 256
    max_tile_m = max(min_rows, _round_up(max_tile_m, min_rows))

    # VMEM budgets: leave headroom under the physical ceiling (64 MiB on v7x,
    # 128 MiB on v4/v5/v6); weights counted double-buffered to be conservative.
    budget = (48 << 20) if gen >= 7 else (96 << 20)
    cap = (52 << 20) if gen >= 7 else (100 << 20)

    w_bytes = (in_pad * hid_aligned + hid_aligned * out_pad) * bpe
    bias_bytes = (hid_aligned + out_pad) * 4
    io_bytes = 2 * max_tile_m * (in_pad * bpe + out_pad * 4)
    resident = (not force_hidden_tiling) and \
        (2 * (w_bytes + bias_bytes) + io_bytes <= budget)

    if resident:
        hid_pad = hid_aligned
        tile_h_final = hid_pad
    else:
        th = max(128, min(_round_up(tile_h, 128), hid_aligned))

        def footprint(th_, tm_):
            return (2 * (in_pad * th_ + th_ * out_pad) * bpe   # w1/w2 tiles (x2 buf)
                    + 2 * th_ * 4 + 2 * out_pad * 4            # b1/b2 tiles
                    + 2 * tm_ * in_pad * bpe                   # x tile
                    + 2 * tm_ * out_pad * 4                    # out tile
                    + tm_ * out_pad * 4)                       # f32 accumulator

        tm = max_tile_m
        while th > 128 and footprint(th, tm) + (8 << 20) > cap:
            th -= 128
        while tm > min_rows and footprint(th, tm) + (8 << 20) > cap:
            tm = max(min_rows, _round_up(tm // 2, min_rows))
        max_tile_m = tm
        tile_h_final = th
        # Pad hidden UP to a multiple of tile_h (exact: GELU(0)=0, w2 rows 0)
        # instead of degrading tile_h.
        hid_pad = _round_up(hid_feat, tile_h_final)

    # Hoisted one-time pad + cast (no per-call weight HBM round trip).
    w1_p = jnp.pad(w1, ((0, in_pad - in_feat),
                        (0, hid_pad - hid_feat))).astype(matmul_dtype)
    b1_p = jnp.pad(b1, (0, hid_pad - hid_feat)).astype(jnp.float32).reshape(1, hid_pad)
    w2_p = jnp.pad(w2, ((0, hid_pad - hid_feat),
                        (0, out_pad - out_feat))).astype(matmul_dtype)
    b2_p = jnp.pad(b2, (0, out_pad - out_feat)).astype(jnp.float32).reshape(1, out_pad)

    plan = _MLPPlan(in_feat, hid_feat, out_feat, in_pad, hid_pad, out_pad,
                    tile_h_final, max_tile_m, matmul_dtype, gen)
    arrays = dict(w1=w1_p, b1=b1_p, w2=w2_p, b2=b2_p)
    return arrays, plan


# ----------------------------------------------------------------------------
# Apply (jittable; `plan` is static via closure/partial)
# ----------------------------------------------------------------------------

def mlp_pallas_apply(x, params, plan):
    """x: (..., in_feat) -> (..., out_feat) using pre-prepared padded weights."""
    w1_p, b1_p = params["w1"], params["b1"]
    w2_p, b2_p = params["w2"], params["b2"]

    orig_shape = x.shape
    assert orig_shape[-1] == plan.in_feat
    out_dtype = x.dtype

    x2d = x.reshape(-1, plan.in_feat)
    M = x2d.shape[0]

    bpe = jnp.dtype(plan.matmul_dtype).itemsize
    out_bpe = jnp.dtype(out_dtype).itemsize
    min_rows = 16 if bpe == 2 else 8

    tile_m = min(plan.max_tile_m, _round_up(M, min_rows))
    tile_m = max(min_rows, (tile_m // min_rows) * min_rows)
    # v7x has 2 TensorCores per chip: make sure the parallel M axis has >= 2
    # tiles when M permits, so both cores get work.
    if plan.gen >= 7 and _round_up(M, tile_m) // tile_m < 2 and M >= 2 * min_rows:
        tile_m = _round_up(_cdiv(M, 2), min_rows)
    m_pad = _round_up(M, tile_m)

    x_p = jnp.pad(x2d, ((0, m_pad - M),
                        (0, plan.in_pad - plan.in_feat))).astype(plan.matmul_dtype)

    num_m = m_pad // tile_m
    num_h = plan.hid_pad // plan.tile_h

    cap = (52 << 20) if plan.gen >= 7 else (100 << 20)
    if num_h == 1:
        footprint = (2 * (plan.in_pad * plan.hid_pad
                          + plan.hid_pad * plan.out_pad) * bpe
                     + 2 * (plan.hid_pad + plan.out_pad) * 4
                     + 2 * tile_m * plan.in_pad * bpe
                     + 2 * tile_m * plan.out_pad * out_bpe)
    else:
        footprint = (2 * (plan.in_pad * plan.tile_h
                          + plan.tile_h * plan.out_pad) * bpe
                     + 2 * plan.tile_h * 4 + 2 * plan.out_pad * 4
                     + 2 * tile_m * plan.in_pad * bpe
                     + 2 * tile_m * plan.out_pad * out_bpe
                     + tile_m * plan.out_pad * 4)
    vmem_limit = int(min(cap, max(32 << 20, footprint + (8 << 20))))

    if num_h == 1:
        # Weights resident in VMEM across all M tiles (constant index maps).
        out = pl.pallas_call(
            _mlp_kernel_resident,
            out_shape=jax.ShapeDtypeStruct((m_pad, plan.out_pad), out_dtype),
            grid_spec=pltpu.PrefetchScalarGridSpec(
                num_scalar_prefetch=0,
                grid=(num_m,),
                in_specs=[
                    pl.BlockSpec((tile_m, plan.in_pad), lambda i: (i, 0)),
                    pl.BlockSpec((plan.in_pad, plan.hid_pad), lambda i: (0, 0)),
                    pl.BlockSpec((1, plan.hid_pad), lambda i: (0, 0)),
                    pl.BlockSpec((plan.hid_pad, plan.out_pad), lambda i: (0, 0)),
                    pl.BlockSpec((1, plan.out_pad), lambda i: (0, 0)),
                ],
                out_specs=pl.BlockSpec((tile_m, plan.out_pad), lambda i: (i, 0)),
            ),
            compiler_params=pltpu.CompilerParams(
                dimension_semantics=("parallel",),
                vmem_limit_bytes=vmem_limit,
            ),
        )(x_p, w1_p, b1_p, w2_p, b2_p)
    else:
        # Hidden axis tiled as a trailing reduction with an f32 accumulator.
        out = pl.pallas_call(
            _mlp_kernel_htiled,
            out_shape=jax.ShapeDtypeStruct((m_pad, plan.out_pad), out_dtype),
            grid_spec=pltpu.PrefetchScalarGridSpec(
                num_scalar_prefetch=0,
                grid=(num_m, num_h),
                in_specs=[
                    pl.BlockSpec((tile_m, plan.in_pad), lambda i, h: (i, 0)),
                    pl.BlockSpec((plan.in_pad, plan.tile_h), lambda i, h: (0, h)),
                    pl.BlockSpec((1, plan.tile_h), lambda i, h: (0, h)),
                    pl.BlockSpec((plan.tile_h, plan.out_pad), lambda i, h: (h, 0)),
                    pl.BlockSpec((1, plan.out_pad), lambda i, h: (0, 0)),
                ],
                out_specs=pl.BlockSpec((tile_m, plan.out_pad), lambda i, h: (i, 0)),
                scratch_shapes=[pltpu.VMEM((tile_m, plan.out_pad), jnp.float32)],
            ),
            compiler_params=pltpu.CompilerParams(
                dimension_semantics=("parallel", "arbitrary"),
                vmem_limit_bytes=vmem_limit,
            ),
        )(x_p, w1_p, b1_p, w2_p, b2_p)

    out = out[:M, :plan.out_feat]
    return out.reshape(*orig_shape[:-1], plan.out_feat)


def mlp_pallas(x, w1, b1, w2, b2, **prepare_kwargs):
    """Convenience one-shot wrapper. For repeated calls, hoist
    `prepare_mlp_params` out of the loop and reuse (arrays, plan)."""
    arrays, plan = prepare_mlp_params(w1, b1, w2, b2, **prepare_kwargs)
    return mlp_pallas_apply(x, arrays, plan)


# ----------------------------------------------------------------------------
# Reference + init helpers
# ----------------------------------------------------------------------------

def init_mlp_params(key, in_feat, hid_feat, out_feat, dtype=jnp.float32):
    """PyTorch nn.Linear-style init (U[-1/sqrt(fan_in), 1/sqrt(fan_in)]).
    Weights stored transposed relative to PyTorch: (fan_in, fan_out)."""
    k1, k2, k3, k4 = jax.random.split(key, 4)
    bound1 = 1.0 / math.sqrt(in_feat)
    bound2 = 1.0 / math.sqrt(hid_feat)
    w1 = jax.random.uniform(k1, (in_feat, hid_feat), dtype, -bound1, bound1)
    b1 = jax.random.uniform(k2, (hid_feat,), dtype, -bound1, bound1)
    w2 = jax.random.uniform(k3, (hid_feat, out_feat), dtype, -bound2, bound2)
    b2 = jax.random.uniform(k4, (out_feat,), dtype, -bound2, bound2)
    return w1, b1, w2, b2


def mlp_reference(x, w1, b1, w2, b2, *, matmul_dtype=jnp.float32):
    """Plain-JAX reference with the same operand-dtype / f32-accumulate recipe."""
    shp = x.shape
    x2 = x.reshape(-1, shp[-1])
    h = jnp.dot(x2.astype(matmul_dtype), w1.astype(matmul_dtype),
                preferred_element_type=jnp.float32) + b1.astype(jnp.float32)
    h = _gelu_erf_f32(h)
    y = jnp.dot(h.astype(matmul_dtype), w2.astype(matmul_dtype),
                preferred_element_type=jnp.float32) + b2.astype(jnp.float32)
    return y.astype(x.dtype).reshape(*shp[:-1], w2.shape[1])


if __name__ == "__main__":
    # Small shapes: batch=2, seq=8, in_feat=32, hid_feat=64, out_feat=32.
    batch, seq, in_feat, hid_feat, out_feat = 2, 8, 32, 64, 32

    key = jax.random.PRNGKey(0)
    kx, kp = jax.random.split(key)
    x = jax.random.normal(kx, (batch, seq, in_feat), dtype=jnp.float32)
    w1, b1, w2, b2 = init_mlp_params(kp, in_feat, hid_feat, out_feat)

    # One-time param preparation (hoisted pad + bf16 cast), then a jitted apply.
    arrays, plan = prepare_mlp_params(w1, b1, w2, b2)
    apply = jax.jit(functools.partial(mlp_pallas_apply, plan=plan))
    y = jax.block_until_ready(apply(x, arrays))
    assert y.shape == (batch, seq, out_feat)

    # Strict check vs a reference using the same bf16-operand recipe.
    y_ref_bf16 = mlp_reference(x, w1, b1, w2, b2, matmul_dtype=jnp.bfloat16)
    assert jnp.allclose(y, y_ref_bf16, atol=2e-3, rtol=2e-3), float(
        jnp.max(jnp.abs(y - y_ref_bf16)))

    # Fidelity check vs the pure-f32 PyTorch math (bf16 operand rounding only).
    y_ref_f32 = mlp_reference(x, w1, b1, w2, b2, matmul_dtype=jnp.float32)
    assert jnp.allclose(y, y_ref_f32, atol=5e-2, rtol=5e-2), float(
        jnp.max(jnp.abs(y - y_ref_f32)))

    # Also exercise the hidden-tiled (reduction) code path at small scale.
    in2, hid2, out2 = 32, 256, 48
    w1b, b1b, w2b, b2b = init_mlp_params(jax.random.PRNGKey(1), in2, hid2, out2)
    x2 = jax.random.normal(jax.random.PRNGKey(2), (batch, seq, in2),
                           dtype=jnp.float32)
    arrays2, plan2 = prepare_mlp_params(w1b, b1b, w2b, b2b, tile_h=128,
                                        force_hidden_tiling=True)
    apply2 = jax.jit(functools.partial(mlp_pallas_apply, plan=plan2))
    y2 = jax.block_until_ready(apply2(x2, arrays2))
    assert y2.shape == (batch, seq, out2)
    y2_ref = mlp_reference(x2, w1b, b1b, w2b, b2b, matmul_dtype=jnp.bfloat16)
    assert jnp.allclose(y2, y2_ref, atol=2e-3, rtol=2e-3), float(
        jnp.max(jnp.abs(y2 - y2_ref)))

    print("KERNEL_OK")
</pallas_src>

<mosaic_0001>
module attributes {stable_mosaic.version = 11 : i64} {
  func.func @_mlp_kernel_resident(%arg0: i32, %arg1: memref<16x128xbf16, #tpu.memory_space<vmem>>, %arg2: memref<128x128xbf16, #tpu.memory_space<vmem>>, %arg3: memref<1x128xf32, #tpu.memory_space<vmem>>, %arg4: memref<128x128xbf16, #tpu.memory_space<vmem>>, %arg5: memref<1x128xf32, #tpu.memory_space<vmem>>, %arg6: memref<16x128xf32, #tpu.memory_space<vmem>>) attributes {dimension_semantics = [#tpu.dimension_semantics<parallel>], iteration_bounds = array<i64: 1>, scalar_prefetch = 0 : i64, scratch_operands = 0 : i64, tpu.core_type = #tpu.core_type<tc>, window_params = [{transform_indices = @transform_0, window_bounds = array<i64: 16, 128>}, {pipeline_mode = #tpu.pipeline_mode<synchronous>, transform_indices = @transform_1, window_bounds = array<i64: 128, 128>}, {pipeline_mode = #tpu.pipeline_mode<synchronous>, transform_indices = @transform_2, window_bounds = array<i64: 1, 128>}, {pipeline_mode = #tpu.pipeline_mode<synchronous>, transform_indices = @transform_3, window_bounds = array<i64: 128, 128>}, {pipeline_mode = #tpu.pipeline_mode<synchronous>, transform_indices = @transform_4, window_bounds = array<i64: 1, 128>}, {transform_indices = @transform_5, window_bounds = array<i64: 16, 128>}]} {
    %c0 = arith.constant 0 : index
    %c0_0 = arith.constant 0 : index
    %0 = vector.load %arg1[%c0, %c0_0] : memref<16x128xbf16, #tpu.memory_space<vmem>>, vector<16x128xbf16>
    %c0_1 = arith.constant 0 : index
    %c0_2 = arith.constant 0 : index
    %1 = vector.load %arg2[%c0_1, %c0_2] : memref<128x128xbf16, #tpu.memory_space<vmem>>, vector<128x128xbf16>
    %cst = arith.constant dense<0.000000e+00> : vector<16x128xf32>
    %2 = tpu.matmul %0, %1, %cst {dimension_numbers = #tpu.dot_dimension_numbers<[1], [0], [0], [1], [0, 0, 1, 1], [], []>} : vector<16x128xbf16>, vector<128x128xbf16>, vector<16x128xf32> -> vector<16x128xf32>
    %c0_3 = arith.constant 0 : index
    %c0_4 = arith.constant 0 : index
    %3 = vector.load %arg3[%c0_3, %c0_4] : memref<1x128xf32, #tpu.memory_space<vmem>>, vector<1x128xf32>
    %4 = vector.broadcast %3 : vector<1x128xf32> to vector<16x128xf32>
    %5 = arith.addf %2, %4 : vector<16x128xf32>
    %cst_5 = arith.constant 5.000000e-01 : f32
    %6 = vector.broadcast %cst_5 : f32 to vector<16x128xf32>
    %7 = arith.mulf %6, %5 : vector<16x128xf32>
    %cst_6 = arith.constant 0.707106769 : f32
    %8 = vector.broadcast %cst_6 : f32 to vector<16x128xf32>
    %9 = arith.mulf %5, %8 : vector<16x128xf32>
    %10 = math.erf %9 : vector<16x128xf32>
    %cst_7 = arith.constant 1.000000e+00 : f32
    %11 = vector.broadcast %cst_7 : f32 to vector<16x128xf32>
    %12 = arith.addf %11, %10 : vector<16x128xf32>
    %13 = arith.mulf %7, %12 : vector<16x128xf32>
    %14 = arith.truncf %13 : vector<16x128xf32> to vector<16x128xbf16>
    %c0_8 = arith.constant 0 : index
    %c0_9 = arith.constant 0 : index
    %15 = vector.load %arg4[%c0_8, %c0_9] : memref<128x128xbf16, #tpu.memory_space<vmem>>, vector<128x128xbf16>
    %cst_10 = arith.constant dense<0.000000e+00> : vector<16x128xf32>
    %16 = tpu.matmul %14, %15, %cst_10 {dimension_numbers = #tpu.dot_dimension_numbers<[1], [0], [0], [1], [0, 0, 1, 1], [], []>} : vector<16x128xbf16>, vector<128x128xbf16>, vector<16x128xf32> -> vector<16x128xf32>
    %c0_11 = arith.constant 0 : index
    %c0_12 = arith.constant 0 : index
    %17 = vector.load %arg5[%c0_11, %c0_12] : memref<1x128xf32, #tpu.memory_space<vmem>>, vector<1x128xf32>
    %18 = vector.broadcast %17 : vector<1x128xf32> to vector<16x128xf32>
    %19 = arith.addf %16, %18 : vector<16x128xf32>
    %c0_13 = arith.constant 0 : index
    %c0_14 = arith.constant 0 : index
    %20 = vector.load %arg6[%c0_13, %c0_14] : memref<16x128xf32, #tpu.memory_space<vmem>>, vector<16x128xf32>
    tpu.vector_store %arg6[%c0_13, %c0_14], %19 {strides = array<i32>} : memref<16x128xf32, #tpu.memory_space<vmem>>, vector<16x128xf32>,
    return
  }
  func.func @transform_0(%arg0: i32) -> (i32, i32) {
    %c0_i32 = arith.constant 0 : i32
    %c0_i32_0 = arith.constant 0 : i32
    return %arg0, %c0_i32 : i32, i32
  }
  func.func @transform_1(%arg0: i32) -> (i32, i32) {
    %c0_i32 = arith.constant 0 : i32
    %c0_i32_0 = arith.constant 0 : i32
    %c0_i32_1 = arith.constant 0 : i32
    return %c0_i32, %c0_i32_0 : i32, i32
  }
  func.func @transform_2(%arg0: i32) -> (i32, i32) {
    %c0_i32 = arith.constant 0 : i32
    %c0_i32_0 = arith.constant 0 : i32
    %c0_i32_1 = arith.constant 0 : i32
    return %c0_i32, %c0_i32_0 : i32, i32
  }
  func.func @transform_3(%arg0: i32) -> (i32, i32) {
    %c0_i32 = arith.constant 0 : i32
    %c0_i32_0 = arith.constant 0 : i32
    %c0_i32_1 = arith.constant 0 : i32
    return %c0_i32, %c0_i32_0 : i32, i32
  }
  func.func @transform_4(%arg0: i32) -> (i32, i32) {
    %c0_i32 = arith.constant 0 : i32
    %c0_i32_0 = arith.constant 0 : i32
    %c0_i32_1 = arith.constant 0 : i32
    return %c0_i32, %c0_i32_0 : i32, i32
  }
  func.func @transform_5(%arg0: i32) -> (i32, i32) {
    %c0_i32 = arith.constant 0 : i32
    %c0_i32_0 = arith.constant 0 : i32
    return %arg0, %c0_i32 : i32, i32
  }
}

</mosaic_0001>

<bundles_post_ra>
// kernel: mlp_pallas_apply.1
= control target key start
LH: loop header
LB: loop body
LE: loop exit
PB: predicated region body
PF: predicated region fallthrough
CT: control target
= control target key end

     0   :  { %10 = vsyncpa [#allocation3], 0  ;;  %s543_s0 = inlined_call_operand.vmem [shape: bf16[16,128], index: 0, kind: input, shape index: {}]   ;;  %s544_s1 = inlined_call_operand.hbm [shape: bf16[128,128], index: 1, kind: input, shape index: {}]   ;;  %s545_s2 = inlined_call_operand.vmem [shape: f32[1,128], index: 2, kind: input, shape index: {}]   ;;  %s546_s3 = inlined_call_operand.hbm [shape: bf16[128,128], index: 3, kind: input, shape index: {}]   ;;  %s547_s4 = inlined_call_operand.vmem [shape: f32[1,128], index: 4, kind: input, shape index: {}]   ;;  %s548_s5 = inlined_call_operand.vmem [shape: f32[16,128], index: 5, kind: output, shape index: {}]  }
   0x1   :  { %s18_s20 = sshll.u32 %s544_s1, 4  ;;  %s19_s20 = int_to_ptr.hbm [resolvable:$true] %s18_s20 }
   0x2   :  { %11 = vsyncpa [#allocation5], 0  ;;  %s470_s21 = smov [#allocation2]   ;;  %s33_s25 = sshll.u32 %s546_s3, 4  ;;  %s34_s25 = int_to_ptr.hbm [resolvable:$true] %s33_s25 }
   0x3   :  { %s20_s22 = sshll.u32 %s470_s21, 4  ;;  %s471_s26 = smov 64   ;;  %s21_s22 = int_to_ptr.vmem [resolvable:$true] %s20_s22 }
   0x4   :  { %s472_s27 = smov 4   ;;  %s473_s28 = smov [#allocation4]  }
   0x5   :  { %26 = dma.hbm_to_vmem [thread:$0]  %s19_s20, 1024, %s21_s22, [#allocation3], %s471_s26, %s471_s26, %s472_s27  }
   0x6   :  { %s35_s29 = sshll.u32 %s473_s28, 4  ;;  %s36_s29 = int_to_ptr.vmem [resolvable:$true] %s35_s29 }
   0x7   :  { %41 = dma.hbm_to_vmem [thread:$0]  %s34_s25, 1024, %s36_s29, [#allocation5], %s471_s26, %s471_s26, %s472_s27  }
   0x8   :  { %466 = dma.done.wait [#allocation3], 1024  }
   0x9   :  { %467 = vsyncadd [#allocation3], 4294966272 }
   0xa   :  { %468 = dma.done.wait [#allocation5], 1024  }
   0xb   :  { %469 = vsyncadd [#allocation5], 4294966272  ;;  %v399_v0 = vld [vmem:[#allocation2 + $0x38] sm:$0xff]  ;;  %v398_v1 = vld [vmem:[#allocation2 + $0x30] sm:$0xff] }
   0xc   :  { %128 = vmatpush.bf16.msra.mxu0 %v399_v0  ;;  %v397_v2 = vld [vmem:[#allocation2 + $0x28] sm:$0xff]  ;;  %v396_v3 = vld [vmem:[#allocation2 + $0x20] sm:$0xff]  ;;  %v395_v4 = vld [vmem:[#allocation2 + $0x18] sm:$0xff] }
   0xd   :  { %v394_v5 = vld [vmem:[#allocation2 + $0x10] sm:$0xff]  ;;  %v393_v6 = vld [vmem:[#allocation2 + $0x8] sm:$0xff]  ;;  %v392_v7 = vld [vmem:[#allocation2] sm:$0xff] }
   0xe   :  { %v391_v8 = vld [vmem:[%s543_s0] sm:$0xff]  ;;  %v407_v10 = vld [vmem:[#allocation4 + $0x38] sm:$0xff]  ;;  %v406_v14 = vld [vmem:[#allocation4 + $0x30] sm:$0xff] }
   0xf   :  { %v412_v9 = vld [vmem:[%s545_s2] ss:$0 sm:$0xff]  ;;  %299 = vmatpush.bf16.msra.mxu1 %v407_v10  ;;  %v405_v16 = vld [vmem:[#allocation4 + $0x28] sm:$0xff]  ;;  %v403_v27 = vld [vmem:[#allocation4 + $0x18] sm:$0xff] }
  0x10   :  { %129 = vmatpush.bf16.msra.mxu0 %v398_v1  ;;  %v404_v21 = vld [vmem:[#allocation4 + $0x20] sm:$0xff]  ;;  %v402_v33 = vld [vmem:[#allocation4 + $0x10] sm:$0xff]  ;;  %v401_v41 = vld [vmem:[#allocation4 + $0x8] sm:$0xff] }
  0x11   :  { %v400_v48 = vld [vmem:[#allocation4] sm:$0xff] }
  0x13   :  { %300 = vmatpush.bf16.msra.mxu1 %v406_v14 }
  0x14   :  { %130 = vmatpush.bf16.msra.mxu0 %v397_v2 }
  0x17   :  { %301 = vmatpush.bf16.msra.mxu1 %v405_v16 }
  0x18   :  { %131 = vmatpush.bf16.msra.mxu0 %v396_v3 }
  0x1b   :  { %302 = vmatpush.bf16.msra.mxu1 %v404_v21 }
  0x1c   :  { %132 = vmatpush.bf16.msra.mxu0 %v395_v4 }
  0x1f   :  { %303 = vmatpush.bf16.msra.mxu1 %v403_v27 }
  0x20   :  { %133 = vmatpush.bf16.msra.mxu0 %v394_v5 }
  0x23   :  { %304 = vmatpush.bf16.msra.mxu1 %v402_v33 }
  0x24   :  { %134 = vmatpush.bf16.msra.mxu0 %v393_v6 }
  0x27   :  { %305 = vmatpush.bf16.msra.mxu1 %v401_v41 }
  0x28   :  { %135 = vmatpush.bf16.msra.mxu0 %v392_v7 }
  0x2b   :  { %136 = vmatmul.bf16.vlgmr.msra.gmra.mxu0 %v391_v8  ;;  %306 = vmatpush.bf16.msra.mxu1 %v400_v48 }
  0xa8   :  { %v137_v11 = vpop.f32.mrf.mxu0 }
  0xa9   :  { %v516_v12 = vadd.f32 %v412_v9, %v137_v11 }
  0xab   :  { %v519_v13 = vmul.f32 0.70710677, %v516_v12 }
  0xad   :  { %v146_v15 = vmul.f32 %v519_v13, %v519_v13 }
  0xaf   :  { %v147_v17 = vmin.f32 %v146_v15, 16.0 }
  0xb0   :  { %v139_v18 = vpop.f32.mrf.mxu0 }
  0xb1   :  { %v148_v19 = vmul.f32 2.1237322e-06, %v147_v17  ;;  %v523_v20 = vadd.f32 %v412_v9, %v139_v18  ;;  %v159_v22 = vmul.f32 3.8918573e-05, %v147_v17 }
  0xb3   :  { %v149_v23 = vadd.f32 0.00028619796, %v148_v19  ;;  %v526_v24 = vmul.f32 0.70710677, %v523_v20  ;;  %v160_v25 = vadd.f32 0.001143296, %v159_v22 }
  0xb5   :  { %v186_v26 = vmul.f32 %v526_v24, %v526_v24  ;;  %v150_v28 = vmul.f32 %v149_v23, %v147_v17  ;;  %v161_v29 = vmul.f32 %v160_v25, %v147_v17 }
  0xb7   :  { %v187_v30 = vmin.f32 %v186_v26, 16.0  ;;  %v162_v31 = vadd.f32 0.014752088, %v161_v29  ;;  %v151_v35 = vadd.f32 0.0036580483, %v150_v28 }
  0xb9   :  { %v188_v32 = vmul.f32 2.1237322e-06, %v187_v30  ;;  %v199_v34 = vmul.f32 3.8918573e-05, %v187_v30  ;;  %v163_v36 = vmul.f32 %v162_v31, %v147_v17  ;;  %v152_v43 = vmul.f32 %v151_v35, %v147_v17 }
  0xba   :  { %v143_v35 = vmul.f32 0.5, %v523_v20 }
  0xbb   :  { %v189_v37 = vadd.f32 0.00028619796, %v188_v32  ;;  %v200_v38 = vadd.f32 0.001143296, %v199_v34  ;;  %v164_v39 = vadd.f32 0.112945676, %v163_v36 }
  0xbc   :  { %v153_v50 = vadd.f32 0.05243302, %v152_v43  ;;  %v142_v34 = vmul.f32 0.5, %v516_v12 }
  0xbd   :  { %v190_v40 = vmul.f32 %v189_v37, %v187_v30  ;;  %v201_v42 = vmul.f32 %v200_v38, %v187_v30  ;;  %v165_v44 = vmul.f32 %v164_v39, %v147_v17 }
  0xbe   :  { %v154_v56 = vmul.f32 %v153_v50, %v147_v17 }
  0xbf   :  { %v191_v45 = vadd.f32 0.0036580483, %v190_v40  ;;  %v202_v46 = vadd.f32 0.014752088, %v201_v42  ;;  %v166_v47 = vadd.f32 0.4994258, %v165_v44 }
  0xc0   :  { %v155_v60 = vadd.f32 0.18741608, %v154_v56 }
  0xc1   :  { %v203_v49 = vmul.f32 %v202_v46, %v187_v30  ;;  %v167_v51 = vmul.f32 %v166_v47, %v147_v17  ;;  %v192_v52 = vmul.f32 %v191_v45, %v187_v30 }
  0xc2   :  { %v156_v1 = vmul.f32 %v155_v60, %v147_v17 }
  0xc3   :  { %v204_v53 = vadd.f32 0.112945676, %v203_v49  ;;  %v168_v54 = vadd.f32 1.0, %v167_v51  ;;  %v193_v57 = vadd.f32 0.05243302, %v192_v52 }
  0xc4   :  { %v157_v7 = vadd.f32 1.1283791, %v156_v1 }
  0xc5   :  { %v205_v55 = vmul.f32 %v204_v53, %v187_v30  ;;  %414 = vrcp.f32 %v168_v54  ;;  %v194_v61 = vmul.f32 %v193_v57, %v187_v30  ;;  %v180_v4 = vand.u32 2147483648, %v168_v54 }
  0xc6   :  { %v178_v6 = vand.u32 2147483647, %v168_v54  ;;  %vm174_vm1 = vweird.f32 %v168_v54  ;;  %v158_v16 = vmul.f32 %v157_v7, %v519_v13 }
  0xc7   :  { %v206_v58 = vadd.f32 0.4994258, %v205_v55  ;;  %v195_v2 = vadd.f32 0.18741608, %v194_v61  ;;  %v181_v11 = vor.u32 1.1754944e-38, %v180_v4 }
  0xc8   :  { %vm179_vm3 = vcmp.eq.f32.partialorder %v178_v6, 8.507059e+37 }
  0xc9   :  { %v207_v59 = vmul.f32 %v206_v58, %v187_v30  ;;  %v196_v9 = vmul.f32 %v195_v2, %v187_v30 }
  0xcb   :  { %v208_v62 = vadd.f32 1.0, %v207_v59  ;;  %v415_v63 = vpop.eup %414  ;;  %v197_v19 = vadd.f32 1.1283791, %v196_v9 }
  0xcc   :  { %v170_v0 = vmul.f32 %v415_v63, %v168_v54  ;;  %vm175_vm0 = vweird.f32 %v415_v63 }
  0xcd   :  { %416 = vrcp.f32 %v208_v62  ;;  %vm176_vm2 = vmor %vm174_vm1, %vm175_vm0  ;;  %v220_v21 = vand.u32 2147483648, %v208_v62  ;;  %v218_v25 = vand.u32 2147483647, %v208_v62  ;;  %vm214_vm5 = vweird.f32 %v208_v62 }
  0xce   :  { %v171_v3 = vsub.f32 1.0, %v170_v0  ;;  %v198_v28 = vmul.f32 %v197_v19, %v526_v24  ;;  %v413_v24 = vld [vmem:[%s547_s4] ss:$0 sm:$0xff] }
  0xcf   :  { %v221_v27 = vor.u32 1.1754944e-38, %v220_v21  ;;  %vm219_vm7 = vcmp.eq.f32.partialorder %v218_v25, 8.507059e+37 }
  0xd0   :  { %v172_v5 = vmul.f32 %v415_v63, %v171_v3 }
  0xd2   :  { %v173_v10 = vadd.f32 %v415_v63, %v172_v5 }
  0xd3   :  { %v417_v8 = vpop.eup %416 }
  0xd4   :  { %v210_v14 = vmul.f32 %v417_v8, %v208_v62  ;;  %v177_v15 = vsel %vm176_vm2, %v415_v63, %v173_v10  ;;  %vm215_vm4 = vweird.f32 %v417_v8 }
  0xd5   :  { %v182_v18 = vsel %vm179_vm3, %v181_v11, %v177_v15  ;;  %vm216_vm6 = vmor %vm214_vm5, %vm215_vm4 }
  0xd6   :  { %v211_v17 = vsub.f32 1.0, %v210_v14  ;;  %v183_v22 = vmul.f32 %v182_v18, %v158_v16 }
  0xd8   :  { %v212_v23 = vmul.f32 %v417_v8, %v211_v17  ;;  %v357_v29 = vclamps-f32 %v183_v22, 1.0 }
  0xda   :  { %v213_v26 = vadd.f32 %v417_v8, %v212_v23  ;;  %v226_v33 = vadd.f32 1.0, %v357_v29 }
  0xdc   :  { %v217_v30 = vsel %vm216_vm6, %v417_v8, %v213_v26  ;;  %v228_v37 = vmul.f32 %v226_v33, %v142_v34 }
  0xdd   :  { %v222_v31 = vsel %vm219_vm7, %v221_v27, %v217_v30 }
  0xde   :  { %v223_v32 = vmul.f32 %v222_v31, %v198_v28 }
  0xe0   :  { %v358_v13 = vclamps-f32 %v223_v32, 1.0 }
  0xe2   :  { %v227_v36 = vadd.f32 1.0, %v358_v13 }
  0xe4   :  { %v229_v38 = vmul.f32 %v227_v36, %v143_v35 }
  0xe6   :  { %v230_v39 = vpack.c.bf16 %v229_v38, %v228_v37 }
  0xe8   :  { %307 = vmatmul.bf16.vlgmr.msra.gmra.mxu1 %v230_v39 }
 0x165   :  { %v308_v40 = vpop.f32.mrf.mxu1 }
 0x166   :  { %v309_v41 = vadd.f32 %v413_v24, %v308_v40 }
 0x168   :  { %313 = vst [vmem:[%s548_s5] sm:$0xff] %v309_v41 }
 0x16d   :  { %v310_v42 = vpop.f32.mrf.mxu1 }
 0x16e   :  { %v311_v43 = vadd.f32 %v413_v24, %v310_v42 }
 0x170   :  { %314 = vst [vmem:[%s548_s5 + $0x8] sm:$0xff] %v311_v43 }
 0x171   :  { %319 = vsyncpa [#allocation3], 1 }
 0x172   :  { %320 = vsyncpa [#allocation5], 1 }

</bundles_post_ra>
